<compile_context>
chip_gen: v7x
topology: tpu7x:2x2x1
jax: 0.10.0
libtpu: 0.0.40
codegen_flags: <defaults>
</compile_context>

<pallas_src>
import math
import numpy as np
import jax
import jax.numpy as jnp
from jax.experimental import pallas as pl
from jax.experimental.pallas import tpu as pltpu


# ----------------------------------------------------------------------------
# Pallas kernel: one batch sample per grid step.
# ----------------------------------------------------------------------------
def _se_kernel(x_ref, w1_ref, b1_ref, w2_ref, b2_ref, o_ref):
    f32 = jnp.float32

    # Squeeze: global average pool over H*W.  Lane-axis sum (XLU) followed by
    # a scalar scale; 1/HW is a compile-time constant.
    hw = x_ref.shape[2]
    pooled = jnp.sum(x_ref[0], axis=1, keepdims=True) * f32(1.0 / hw)  # (C, 1)

    # Excitation: Linear -> ReLU -> Linear -> Sigmoid (all f32, tiny).
    z = jnp.dot(w1_ref[...], pooled, preferred_element_type=f32) + b1_ref[...]
    z = jnp.maximum(z, 0.0)                                            # (Cr, 1)
    pre = jnp.dot(w2_ref[...], z, preferred_element_type=f32) + b2_ref[...]
    s = 1.0 / (1.0 + jnp.exp(-pre))                                    # (C, 1)

    # Scale: re-read x from VMEM (keeps vreg live ranges short) and broadcast
    # the (C,1) gate over the lane axis; the store is lane-dense.
    o_ref[0] = x_ref[0] * s


# ----------------------------------------------------------------------------
# Wrapper: NCHW <-> (N, C, H*W) plumbing + pallas_call.
# ----------------------------------------------------------------------------
def seblock_pallas(x_nchw, w1, b1, w2, b2):
    N, C, H, W = x_nchw.shape
    HW = H * W
    Cr = w1.shape[0]

    x3 = x_nchw.reshape(N, C, HW)

    out3 = pl.pallas_call(
        _se_kernel,
        out_shape=jax.ShapeDtypeStruct((N, C, HW), x_nchw.dtype),
        grid=(N,),
        in_specs=[
            pl.BlockSpec((1, C, HW), lambda n: (n, 0, 0)),   # x: one sample
            pl.BlockSpec((Cr, C), lambda n: (0, 0)),         # W1 (full array)
            pl.BlockSpec((Cr, 1), lambda n: (0, 0)),         # b1
            pl.BlockSpec((C, Cr), lambda n: (0, 0)),         # W2
            pl.BlockSpec((C, 1), lambda n: (0, 0)),          # b2
        ],
        out_specs=pl.BlockSpec((1, C, HW), lambda n: (n, 0, 0)),
        compiler_params=pltpu.CompilerParams(
            dimension_semantics=("parallel",)),               # v7x: 2 TCs
    )(x3, w1, b1.reshape(Cr, 1), w2, b2.reshape(C, 1))

    return out3.reshape(N, C, H, W)


# ----------------------------------------------------------------------------
# Pure-JAX reference (mirrors the PyTorch SEBlock.forward).
# ----------------------------------------------------------------------------
def ref_forward(x, w1, b1, w2, b2):
    hp = jax.lax.Precision.HIGHEST
    pooled = jnp.mean(x, axis=(2, 3))                                  # (N, C)
    z = jnp.maximum(jnp.dot(pooled, w1.T, precision=hp) + b1, 0.0)     # (N, Cr)
    s = jax.nn.sigmoid(jnp.dot(z, w2.T, precision=hp) + b2)            # (N, C)
    return x * s[:, :, None, None]


# ----------------------------------------------------------------------------
# Deterministic init (xavier_uniform weights, zero biases) + driver.
# ----------------------------------------------------------------------------
def _xavier(key, shape, fan_in, fan_out):
    bound = math.sqrt(6.0 / (fan_in + fan_out))
    return jax.random.uniform(key, shape, jnp.float32, -bound, bound)


if __name__ == "__main__":
    # Small shapes consistent with SEBlock(n_channels=32, reduction_ratio=16).
    N, C, H, W = 2, 32, 16, 16
    reduction_ratio = 16
    Cr = C // reduction_ratio

    key = jax.random.PRNGKey(0)
    kx, k1, k2 = jax.random.split(key, 3)

    x = jax.random.normal(kx, (N, C, H, W), jnp.float32)
    w1 = _xavier(k1, (Cr, C), C, Cr)          # Linear(C -> C/r) weight
    w2 = _xavier(k2, (C, Cr), Cr, C)          # Linear(C/r -> C) weight
    b1 = jnp.zeros((Cr,), jnp.float32)
    b2 = jnp.zeros((C,), jnp.float32)

    out = jax.block_until_ready(seblock_pallas(x, w1, b1, w2, b2))
    ref = jax.block_until_ready(ref_forward(x, w1, b1, w2, b2))

    np.testing.assert_allclose(np.asarray(out), np.asarray(ref),
                               rtol=1e-3, atol=1e-3)
    print("KERNEL_OK")
</pallas_src>

<mosaic_0001>
module attributes {stable_mosaic.version = 11 : i64} {
  func.func @_se_kernel(%arg0: i32, %arg1: memref<1x32x256xf32, #tpu.memory_space<vmem>>, %arg2: memref<2x32xf32, #tpu.memory_space<vmem>>, %arg3: memref<2x1xf32, #tpu.memory_space<vmem>>, %arg4: memref<32x2xf32, #tpu.memory_space<vmem>>, %arg5: memref<32x1xf32, #tpu.memory_space<vmem>>, %arg6: memref<1x32x256xf32, #tpu.memory_space<vmem>>) attributes {dimension_semantics = [#tpu.dimension_semantics<parallel>], iteration_bounds = array<i64: 2>, scalar_prefetch = 0 : i64, scratch_operands = 0 : i64, tpu.core_type = #tpu.core_type<tc>, window_params = [{transform_indices = @transform_0, window_bounds = array<i64: 1, 32, 256>}, {pipeline_mode = #tpu.pipeline_mode<synchronous>, transform_indices = @transform_1, window_bounds = array<i64: 2, 32>}, {pipeline_mode = #tpu.pipeline_mode<synchronous>, transform_indices = @transform_2, window_bounds = array<i64: 2, 1>}, {pipeline_mode = #tpu.pipeline_mode<synchronous>, transform_indices = @transform_3, window_bounds = array<i64: 32, 2>}, {pipeline_mode = #tpu.pipeline_mode<synchronous>, transform_indices = @transform_4, window_bounds = array<i64: 32, 1>}, {transform_indices = @transform_5, window_bounds = array<i64: 1, 32, 256>}]} {
    %c0 = arith.constant 0 : index
    %c0_0 = arith.constant 0 : index
    %c0_1 = arith.constant 0 : index
    %0 = vector.load %arg1[%c0, %c0_0, %c0_1] : memref<1x32x256xf32, #tpu.memory_space<vmem>>, vector<1x32x256xf32>
    %1 = vector.shape_cast %0 : vector<1x32x256xf32> to vector<32x256xf32>
    %cst = arith.constant dense<0.000000e+00> : vector<32xf32>
    %2 = vector.multi_reduction <add>, %1, %cst [1] : vector<32x256xf32> to vector<32xf32>
    %3 = vector.shape_cast %2 : vector<32xf32> to vector<32x1xf32>
    %cst_2 = arith.constant 3.906250e-03 : f32
    %4 = vector.broadcast %cst_2 : f32 to vector<32x1xf32>
    %5 = arith.mulf %3, %4 : vector<32x1xf32>
    %c0_3 = arith.constant 0 : index
    %c0_4 = arith.constant 0 : index
    %6 = vector.load %arg2[%c0_3, %c0_4] : memref<2x32xf32, #tpu.memory_space<vmem>>, vector<2x32xf32>
    %cst_5 = arith.constant dense<0.000000e+00> : vector<2x1xf32>
    %7 = tpu.matmul %6, %5, %cst_5 {dimension_numbers = #tpu.dot_dimension_numbers<[1], [0], [0], [1], [0, 0, 1, 1], [], []>} : vector<2x32xf32>, vector<32x1xf32>, vector<2x1xf32> -> vector<2x1xf32>
    %c0_6 = arith.constant 0 : index
    %c0_7 = arith.constant 0 : index
    %8 = vector.load %arg3[%c0_6, %c0_7] : memref<2x1xf32, #tpu.memory_space<vmem>>, vector<2x1xf32>
    %9 = arith.addf %7, %8 : vector<2x1xf32>
    %cst_8 = arith.constant 0.000000e+00 : f32
    %10 = vector.broadcast %cst_8 : f32 to vector<2x1xf32>
    %11 = arith.maximumf %9, %10 : vector<2x1xf32>
    %c0_9 = arith.constant 0 : index
    %c0_10 = arith.constant 0 : index
    %12 = vector.load %arg4[%c0_9, %c0_10] : memref<32x2xf32, #tpu.memory_space<vmem>>, vector<32x2xf32>
    %cst_11 = arith.constant dense<0.000000e+00> : vector<32x1xf32>
    %13 = tpu.matmul %12, %11, %cst_11 {dimension_numbers = #tpu.dot_dimension_numbers<[1], [0], [0], [1], [0, 0, 1, 1], [], []>} : vector<32x2xf32>, vector<2x1xf32>, vector<32x1xf32> -> vector<32x1xf32>
    %c0_12 = arith.constant 0 : index
    %c0_13 = arith.constant 0 : index
    %14 = vector.load %arg5[%c0_12, %c0_13] : memref<32x1xf32, #tpu.memory_space<vmem>>, vector<32x1xf32>
    %15 = arith.addf %13, %14 : vector<32x1xf32>
    %cst_14 = arith.constant 0.000000e+00 : f32
    %16 = vector.broadcast %cst_14 : f32 to vector<32x1xf32>
    %17 = arith.subf %16, %15 : vector<32x1xf32>
    %18 = math.exp %17 : vector<32x1xf32>
    %cst_15 = arith.constant 1.000000e+00 : f32
    %19 = vector.broadcast %cst_15 : f32 to vector<32x1xf32>
    %20 = arith.addf %19, %18 : vector<32x1xf32>
    %cst_16 = arith.constant 1.000000e+00 : f32
    %21 = vector.broadcast %cst_16 : f32 to vector<32x1xf32>
    %22 = arith.divf %21, %20 : vector<32x1xf32>
    %c0_17 = arith.constant 0 : index
    %c0_18 = arith.constant 0 : index
    %c0_19 = arith.constant 0 : index
    %23 = vector.load %arg1[%c0_17, %c0_18, %c0_19] : memref<1x32x256xf32, #tpu.memory_space<vmem>>, vector<1x32x256xf32>
    %24 = vector.shape_cast %23 : vector<1x32x256xf32> to vector<32x256xf32>
    %25 = vector.broadcast %22 : vector<32x1xf32> to vector<32x256xf32>
    %26 = arith.mulf %24, %25 : vector<32x256xf32>
    %c0_20 = arith.constant 0 : index
    %c0_21 = arith.constant 0 : index
    %c0_22 = arith.constant 0 : index
    %27 = vector.load %arg6[%c0_20, %c0_21, %c0_22] : memref<1x32x256xf32, #tpu.memory_space<vmem>>, vector<1x32x256xf32>
    %28 = vector.shape_cast %27 : vector<1x32x256xf32> to vector<32x256xf32>
    %29 = vector.shape_cast %26 : vector<32x256xf32> to vector<1x32x256xf32>
    tpu.vector_store %arg6[%c0_20, %c0_21, %c0_22], %29 {strides = array<i32>} : memref<1x32x256xf32, #tpu.memory_space<vmem>>, vector<1x32x256xf32>,
    return
  }
  func.func @transform_0(%arg0: i32) -> (i32, i32, i32) {
    %c0_i32 = arith.constant 0 : i32
    %c0_i32_0 = arith.constant 0 : i32
    %c0_i32_1 = arith.constant 0 : i32
    return %arg0, %c0_i32, %c0_i32_0 : i32, i32, i32
  }
  func.func @transform_1(%arg0: i32) -> (i32, i32) {
    %c0_i32 = arith.constant 0 : i32
    %c0_i32_0 = arith.constant 0 : i32
    %c0_i32_1 = arith.constant 0 : i32
    return %c0_i32, %c0_i32_0 : i32, i32
  }
  func.func @transform_2(%arg0: i32) -> (i32, i32) {
    %c0_i32 = arith.constant 0 : i32
    %c0_i32_0 = arith.constant 0 : i32
    %c0_i32_1 = arith.constant 0 : i32
    return %c0_i32, %c0_i32_0 : i32, i32
  }
  func.func @transform_3(%arg0: i32) -> (i32, i32) {
    %c0_i32 = arith.constant 0 : i32
    %c0_i32_0 = arith.constant 0 : i32
    %c0_i32_1 = arith.constant 0 : i32
    return %c0_i32, %c0_i32_0 : i32, i32
  }
  func.func @transform_4(%arg0: i32) -> (i32, i32) {
    %c0_i32 = arith.constant 0 : i32
    %c0_i32_0 = arith.constant 0 : i32
    %c0_i32_1 = arith.constant 0 : i32
    return %c0_i32, %c0_i32_0 : i32, i32
  }
  func.func @transform_5(%arg0: i32) -> (i32, i32, i32) {
    %c0_i32 = arith.constant 0 : i32
    %c0_i32_0 = arith.constant 0 : i32
    %c0_i32_1 = arith.constant 0 : i32
    return %arg0, %c0_i32, %c0_i32_0 : i32, i32, i32
  }
}

</mosaic_0001>

<bundles_post_ra>
// kernel: tpu_custom_call.1
= control target key start
LH: loop header
LB: loop body
LE: loop exit
PB: predicated region body
PF: predicated region fallthrough
CT: control target
= control target key end

     0   :  { %10 = vsyncpa [#allocation3], 0  ;;  %s1096_s0 = inlined_call_operand.hbm [shape: f32[2,32,256], index: 0, kind: input, shape index: {}]   ;;  %s1097_s1 = inlined_call_operand.vmem [shape: f32[2,32], index: 1, kind: input, shape index: {}]   ;;  %s1098_s2 = inlined_call_operand.vmem [shape: f32[2,1], index: 2, kind: input, shape index: {}]   ;;  %s1099_s3 = inlined_call_operand.vmem [shape: f32[32,2], index: 3, kind: input, shape index: {}]   ;;  %s1100_s4 = inlined_call_operand.vmem [shape: f32[32,1], index: 4, kind: input, shape index: {}]   ;;  %s1101_s5 = inlined_call_operand.hbm [shape: f32[2,32,256], index: 5, kind: output, shape index: {}]  }
   0x1   :  { %12 = vsyncpa [#allocation3 + $0x1], 0 }
   0x2   :  { %13 = vsyncpa [#allocation4], 0 }
   0x3   :  { %15 = vsyncpa [#allocation4 + $0x1], 0  ;;  %s868_s18 = smov 0   ;;  %s870_s19 = smov 0  }
   0x4   :  { %s872_s20 = smov 0   ;;  %s874_s21 = smov 0  }
   0x5 LB: > { %s889_s22 = sadd.s32 4294967295, %s826_s21   ;;  %s601_s23 = sadd.s32 4294967294, %s826_s21   ;;  %s826_s21 = sphi %s874_s21, %s1114_s21   ;;  %s822_s20 = sphi %s872_s20, %s1113_s20   ;;  %s818_s19 = sphi %s870_s19, %s1112_s19   ;;  %s814_s18 = sphi %s868_s18, %s1111_s18  }
   0x6   : > { %s893_s24 = sadd.s32 1, %s826_s21   ;;  %s28_s25 = sadd.s32 1, %s822_s20 }
   0x7   : > { %s25_s26 = ssub.s32 %s826_s21, %s893_s24  ;;  %p35_p0 = scmp.ne.s32.totalorder %s822_s20, %s818_s19 }
   0x8   : > { %p26_p1 = scmp.eq.s32.totalorder %s25_s26, 0  ;;  %p36_p2 = scmp.eq.s32.totalorder %s826_s21, 0 }
   0x9   : > { %p41_p3 = scmp.ne.s32.totalorder %s818_s19, %s814_s18  ;;  %p42_p4 = scmp.eq.s32.totalorder %s889_s22, 0 }
   0xa   : > { %s905_s27 = scalar_select %p26_p1, %s822_s20, %s28_s25  }
   0xb   : > { %p907_p5 = por %p36_p2, %p35_p0  ;;  %p911_p6 = por %p42_p4, %p41_p3 }
   0xc   : > { %p149_p7 = scmp.eq.s32.totalorder %s889_s22, 1  ;;  %p155_p8 = scmp.eq.s32.totalorder %s601_s23, 1 }
   0xd   : > { %p670_p10 = scmp.lt.s32.totalorder %s826_s21, 2  ;;  %s187_s7 = sand.u32 1, %s822_s20  }
   0xe   : > { %p918_p11 = por %p149_p7, %p35_p0  ;;  %p922_p12 = por %p155_p8, %p41_p3 }
   0xf   : > { %s621_s8 = sshll.u32 %s826_s21, 10  ;;  %s604_s9 = sshll.u32 %s187_s7, 6 }
  0x10   : > { %s1105_s30 = scalar_select %p918_p11, 1, 0 }
  0x11   : > { %s1106_s6 = scalar_select %p922_p12, 1, 0 }
  0x12   : > { %s931_s12 = scalar_lea.hbm %s1096_s0, %s621_s8  ;;  %s191_s13 = scalar_lea.vmem [#allocation2], %s604_s9 }
  0x13   : > { %s198_s14 = sshll.u32 %s191_s13, 4  ;;  %p935_p13 = pnand %p670_p10, %p907_p5  ;;  %s939_s14 = int_to_ptr.vmem [resolvable:$true] %s198_s14 }
  0x14   : > { %s941_s16 = scalar_lea.sflag [#allocation3], %s187_s7  ;;  %s730_s17 = scalar_lea.hbm %s931_s12, 1024 }
  0x15   : > { %p731_p0 = scmp.ne.s32.totalorder %s931_s12, %s730_s17  ;;  %p732_p1 = pneg %p935_p13 }
  0x16   : > { %s735_s26 = scalar_lea.hbm %s1096_s0, 2048  ;;  %p736_p4 = scmp.lt.u32.totalorder %s931_s12, %s1096_s0 }
  0x17   : > { %p733_p2 = pnand %p732_p1, %p731_p0  ;;  %p737_p5 = scmp.lt.u32.totalorder %s735_s26, %s730_s17 }
  0x18   : > { %p739_p8 = scmp.lt.u32.totalorder %s730_s17, %s931_s12 }
  0x19   : > { %p734_p3 = pneg %p733_p2  ;;  %p738_p7 = por %p737_p5, %p736_p4 }
  0x1b   : > { %p740_p10 = por %p739_p8, %p738_p7 }
  0x1d   : > { %p741_p9 = pnand %p740_p10, %p734_p3 }
  0x1f   : > { %744 = shalt.err (!%p741_p9)
}
  0x20   : > { %s745_s7 = scalar_lea.vmem %s939_s14, 1024  ;;  %s828_s9 = smov [#allocation2]  }
  0x21   : > { %p746_p0 = scmp.ne.s32.totalorder %s939_s14, %s745_s7  ;;  %s750_s10 = sshll.u32 %s828_s9, 4  ;;  %s751_s10 = int_to_ptr.vmem [resolvable:$false] %s750_s10 }
  0x22   : > { %s752_s11 = scalar_lea.vmem %s751_s10, 2048  ;;  %p753_p11 = scmp.lt.s32.totalorder %s939_s14, %s751_s10 }
  0x23   : > { %p748_p2 = pnand %p746_p0, %p732_p1  ;;  %p754_p4 = scmp.lt.s32.totalorder %s752_s11, %s745_s7 }
  0x25   : > { %p749_p12 = pneg %p748_p2  ;;  %p755_p5 = por %p754_p4, %p753_p11 }
  0x27   : > { %p756_p7 = pnand %p755_p5, %p749_p12 }
  0x29   : > { %759 = shalt.err (!%p756_p7)
}
  0x2a   : > { %s829_s13 = smov 256   ;;  %s830_s17 = smov 16  }
  0x2b   : > { %665 = dma.hbm_to_vmem [thread:$0]  (!%p935_p13), %s931_s12, 1024, %s939_s14, %s941_s16, %s829_s13, %s829_s13, %s830_s17  }
  0x2c   : > { %p607_p9 = scmp.ge.s32.totalorder %s826_s21, 1  ;;  %p206_p1 = scmp.lt.s32.totalorder %s826_s21, 3 }
  0x2e   : > { %p207_p3 = pnand %p607_p9, %p206_p1 }
  0x2f   : > { %s972_s23 = sand.u32 (!%p207_p3), 1, %s818_s19  }
  0x30   : > { %210 = sbr.rel (%p207_p3) target bundleno = 831 (0x33f), region = 40  ;;  %s608_s25 = sshll.u32 (!%p207_p3), %s972_s23, 6 }
  0x31   : > { %s213_s26 = scalar_lea.sflag (!%p207_p3), [#allocation3], %s972_s23  ;;  %s216_s28 = scalar_lea.vmem (!%p207_p3), [#allocation2], %s608_s25 }
  0x37   : > { %805 = dma.done.wait (%p911_p6), %s213_s26, 1024  }
  0x38   : > { %807 = vsyncadd (%p911_p6), %s213_s26, 4294966272  ;;  %v982_v0 = vld [vmem:[%s216_s28 + $0x20] sm:$0xff]  ;;  %v984_v1 = vld [vmem:[%s216_s28 + $0x28] sm:$0xff]  ;;  %v831_v12 = vmov 0.0|0.0   ;;  %vm832_vm0 = vmmov 0   ;;  %v833_v13 = vmov 0.0  }
  0x39   : > { %v986_v2 = vld [vmem:[%s216_s28] sm:$0xff]  ;;  %v257_v3 = vadd.f32 %v984_v1, %v982_v0  ;;  %v990_v4 = vld [vmem:[%s216_s28 + $0x8] sm:$0xff]  ;;  %v992_v5 = vld [vmem:[%s216_s28 + $0x30] sm:$0xff]  ;;  %652 = vmatprep.subr.bf16.mxu0 %v831_v12  ;;  %641 = vmatprep.mubr.msk.f32.mxu0 %vm832_vm0, %v833_v13  ;;  %vm269_vm1 = vcmask 261120   ;;  %vm352_vm2 = vcmask 15360   ;;  %vm365_vm3 = vcmask 1041408  }
  0x3a   : > { %v994_v6 = vld [vmem:[%s216_s28 + $0x38] sm:$0xff]  ;;  %v251_v7 = vadd.f32 %v990_v4, %v986_v2  ;;  %v998_v8 = vld [vmem:[%s216_s28 + $0x10] sm:$0xff]  ;;  %v267_v24 = vld [vmem:[%s1097_s1] sm:$0x3]  ;;  %v834_v34 = vmov 0   ;;  %s242_s7 = scalar_lea.vmem [#allocation5], %s608_s25 }
  0x3b   : > { %v1000_v9 = vld [vmem:[%s216_s28 + $0x18] sm:$0xff]  ;;  %258 = vadd.xlane.f32.xlu1 %v257_v3  ;;  %v260_v10 = vadd.f32 %v994_v6, %v992_v5  ;;  %v344_v25 = vld [vmem:[%s1099_s3] sm:$0xff]  ;;  %v345_v31 = vld [vmem:[%s1099_s3 + $0x8] sm:$0xff]  ;;  %712 = vset.pattern.permute.xlu0 %v834_v34  ;;  %s528_s9 = sshll.u32 %s242_s7, 4  ;;  %s622_s10 = sshll.u32 %s889_s22, 10  ;;  %s1045_s9 = int_to_ptr.vmem [resolvable:$true] %s528_s9 }
  0x3c   : > { %252 = vadd.xlane.f32.xlu0 %v251_v7  ;;  %v254_v11 = vadd.f32 %v1000_v9, %v998_v8  ;;  %646 = vmatprep.mubr.msk.f32.mxu1 %vm352_vm2, %v344_v25  ;;  %v268_v26 = vld [vmem:[%s1098_s2] sm:$0x3]  ;;  %v346_v32 = vld [vmem:[%s1099_s3 + $0x10] sm:$0xff]  ;;  %v347_v33 = vld [vmem:[%s1099_s3 + $0x18] sm:$0xff]  ;;  %s1050_s13 = scalar_lea.hbm %s1101_s5, %s622_s10  ;;  %s515_s22 = scalar_lea.sflag [#allocation4], %s972_s23 }
  0x3d   : > { %713 = vset.pattern.permute.xlu1 %v834_v34  ;;  %v349_v35 = vld [vmem:[%s1100_s4 + $0x8] sm:$0xff]  ;;  %v348_v36 = vld [vmem:[%s1100_s4] sm:$0xff]  ;;  %v351_v41 = vld [vmem:[%s1100_s4 + $0x18] sm:$0xff]  ;;  %s760_s17 = scalar_lea.vmem %s1045_s9, 1024  ;;  %p1108_p11 = scmp.ne.s32.totalorder %s1105_s30, 0 }
  0x3e   : > { %v350_v43 = vld [vmem:[%s1100_s4 + $0x10] sm:$0xff]  ;;  %p761_p6 = scmp.ne.s32.totalorder %s1045_s9, %s760_s17  ;;  %s835_s26 = smov [#allocation5]  }
  0x3f   : > { %261 = vadd.xlane.f32.xlu1 %v260_v10  ;;  %s764_s28 = sshll.u32 %s835_s26, 4  ;;  %s765_s28 = int_to_ptr.vmem [resolvable:$false] %s764_s28 }
  0x40   : > { %255 = vadd.xlane.f32.xlu0 %v254_v11  ;;  %p762_p12 = pnand %p761_p6, %p1108_p11  ;;  %s766_s29 = scalar_lea.vmem %s765_s28, 2048 }
  0x41   : > { %p767_p8 = scmp.lt.s32.totalorder %s1045_s9, %s765_s28  ;;  %p768_p10 = scmp.lt.s32.totalorder %s766_s29, %s760_s17 }
  0x42   : > { %p763_p13 = pneg %p762_p12 }
  0x43   : > { %p769_p0 = por %p768_p10, %p767_p8 }
  0x45   : > { %p770_p2 = pnand %p769_p0, %p763_p13 }
  0xc8   : > { %v259_v14 = vpop.xlane.xlu1 %258 }
  0xc9   : > { %v253_v15 = vpop.xlane.xlu0 %252  ;;  %v265_v20 = vmul.f32 0.00390625, %v259_v14 }
  0xca   : > { %v263_v18 = vmul.f32 0.00390625, %v253_v15 }
  0xcc   : > { %v262_v16 = vpop.xlane.xlu1 %261 }
  0xcd   : > { %v256_v17 = vpop.xlane.xlu0 %255  ;;  %v266_v21 = vmul.f32 0.00390625, %v262_v16 }
  0xce   : > { %v264_v19 = vmul.f32 0.00390625, %v256_v17 }
  0xcf   : > { %v656_v23 = vpack.c.bf16 %v266_v21, %v265_v20 }
  0xd0   : > { %v653_v22 = vpack.c.bf16 %v264_v19, %v263_v18 }
  0xd2   : > { %654 = vmatpush3.bf16.msra.mxu0 %v653_v22 }
  0xd3   : > { %655 = vmatprep.subr.bf16.mxu0 %v831_v12 }
  0xd6   : > { %657 = vmatpush3.bf16.msra.mxu0 %v656_v23 }
  0xd9   : > { %642 = vmatmul.mubr.msk.f32.vlgmr.msra.gmra.mrb[0].mxu0 %vm269_vm1, %v267_v24 }
 0x1ac   : > { %v339_v27 = vpop.f32.mrb[0].mxu0 }
 0x1ad   : > { %v340_v28 = vadd.f32 %v339_v27, %v268_v26  ;;  %v643_v29 = vpop.f32.mrb[1].mxu0 }
 0x1af   : > { %v343_v30 = vmax.f32 %v340_v28, 0.0 }
 0x1b1   : > { %644 = vmatprep.subr.msk.mxu1 %vm365_vm3, %v343_v30 }
 0x1b2   : > { %645 = vmatpush3.msk.msra.mxu1 %vm365_vm3, %v343_v30 }
 0x1b3   : > { %647 = vmatmul.mubr.msk.f32.vlgmr.msra.gmra.mrb[0].mxu1 %vm352_vm2, %v345_v31 }
 0x1b4   : > { %649 = vmatprep.mubr.msk.f32.mxu1 %vm352_vm2, %v346_v32 }
 0x1b7   : > { %650 = vmatmul.mubr.msk.f32.gmra.mrb[2].mxu1 %vm352_vm2, %v347_v33 }
 0x286   : > { %v648_v37 = vpop.f32.mrb[0].mxu1 }
 0x287   : > { %v441_v38 = vadd.f32 %v648_v37, %v349_v35  ;;  %v435_v39 = vpop.f32.mrb[1].mxu1 }
 0x288   : > { %v436_v40 = vadd.f32 %v435_v39, %v348_v36 }
 0x289   : > { %v455_v42 = vsub.f32 0.0, %v441_v38 }
 0x28a   : > { %v454_v44 = vsub.f32 0.0, %v436_v40  ;;  %v651_v45 = vpop.f32.mrb[2].mxu1 }
 0x28b   : > { %v460_v46 = vmul.f32 1.442695, %v455_v42  ;;  %v451_v47 = vadd.f32 %v651_v45, %v351_v41  ;;  %v445_v48 = vpop.f32.mrb[3].mxu1 }
 0x28c   : > { %v458_v49 = vmul.f32 1.442695, %v454_v44  ;;  %v446_v50 = vadd.f32 %v445_v48, %v350_v43 }
 0x28d   : > { %714 = vpow2.f32 %v460_v46  ;;  %v457_v51 = vsub.f32 0.0, %v451_v47 }
 0x28e   : > { %716 = vpow2.f32 %v458_v49  ;;  %v456_v52 = vsub.f32 0.0, %v446_v50 }
 0x28f   : > { %v464_v53 = vmul.f32 1.442695, %v457_v51 }
 0x290   : > { %v462_v54 = vmul.f32 1.442695, %v456_v52 }
 0x291   : > { %718 = vpow2.f32 %v464_v53 }
 0x292   : > { %720 = vpow2.f32 %v462_v54 }
 0x297   : > { %v715_v55 = vpop.eup %714 }
 0x298   : > { %v717_v56 = vpop.eup %716  ;;  %v467_v57 = vadd.f32 1.0, %v715_v55 }
 0x299   : > { %v466_v58 = vadd.f32 1.0, %v717_v56 }
 0x29a   : > { %722 = vrcp.f32 %v467_v57 }
 0x29b   : > { %v719_v59 = vpop.eup %718  ;;  %724 = vrcp.f32 %v466_v58 }
 0x29c   : > { %v721_v60 = vpop.eup %720  ;;  %v469_v62 = vadd.f32 1.0, %v719_v59 }
 0x29d   : > { %v468_v61 = vadd.f32 1.0, %v721_v60 }
 0x29f   : > { %726 = vrcp.f32 %v468_v61 }
 0x2a0   : > { %728 = vrcp.f32 %v469_v62 }
 0x2a4   : > { %v723_v63 = vpop.eup %722 }
 0x2a5   : > { %v725_v3 = vpop.eup %724  ;;  %485 = vperm.xlu1 %713, %v723_v63  }
 0x2a6   : > { %480 = vperm.xlu0 %712, %v725_v3  }
 0x2a9   : > { %v727_v7 = vpop.eup %726 }
 0x2aa   : > { %490 = vperm.xlu1 %713, %v727_v7   ;;  %v729_v10 = vpop.eup %728 }
 0x2ae   : > { %495 = vperm.xlu1 %713, %v729_v10  }
 0x324   : > { %v486_v11 = vpop.permute.xlu1 %485 }
 0x325   : > { %v500_v12 = vmul.f32 %v486_v11, %v998_v8  ;;  %v501_v13 = vmul.f32 %v486_v11, %v1000_v9  ;;  %v481_v14 = vpop.permute.xlu0 %480 }
 0x326   : > { %v498_v15 = vmul.f32 %v481_v14, %v986_v2  ;;  %v499_v16 = vmul.f32 %v481_v14, %v990_v4 }
 0x327   : > { %508 = vst [vmem:[%s242_s7 + $0x10] sm:$0xff] %v500_v12  ;;  %509 = vst [vmem:[%s242_s7 + $0x18] sm:$0xff] %v501_v13 }
 0x328   : > { %506 = vst [vmem:[%s242_s7] sm:$0xff] %v498_v15  ;;  %507 = vst [vmem:[%s242_s7 + $0x8] sm:$0xff] %v499_v16 }
 0x329   : > { %v491_v17 = vpop.permute.xlu1 %490 }
 0x32a   : > { %v502_v18 = vmul.f32 %v491_v17, %v982_v0  ;;  %v503_v8 = vmul.f32 %v491_v17, %v984_v1 }
 0x32c   : > { %510 = vst [vmem:[%s242_s7 + $0x20] sm:$0xff] %v502_v18  ;;  %511 = vst [vmem:[%s242_s7 + $0x28] sm:$0xff] %v503_v8 }
 0x32d   : > { %v496_v2 = vpop.permute.xlu1 %495 }
 0x32e   : > { %v504_v4 = vmul.f32 %v496_v2, %v992_v5  ;;  %v505_v0 = vmul.f32 %v496_v2, %v994_v6 }
 0x330   : > { %512 = vst [vmem:[%s242_s7 + $0x30] sm:$0xff] %v504_v4  ;;  %513 = vst [vmem:[%s242_s7 + $0x38] sm:$0xff] %v505_v0 }
 0x331   : > { %773 = shalt.err (!%p770_p2)
}
 0x332   : > { %s774_s12 = scalar_lea.hbm %s1050_s13, 1024  ;;  %s778_s16 = scalar_lea.hbm %s1101_s5, 2048 }
 0x333   : > { %p775_p4 = scmp.ne.s32.totalorder %s1050_s13, %s774_s12  ;;  %p779_p9 = scmp.lt.u32.totalorder %s1050_s13, %s1101_s5 }
 0x334   : > { %p780_p1 = scmp.lt.u32.totalorder %s778_s16, %s774_s12  ;;  %p782_p6 = scmp.lt.u32.totalorder %s774_s12, %s1050_s13 }
 0x335   : > { %p776_p5 = pnand %p775_p4, %p1108_p11 }
 0x336   : > { %p781_p3 = por %p780_p1, %p779_p9 }
 0x337   : > { %p777_p7 = pneg %p776_p5 }
 0x338   : > { %p783_p12 = por %p782_p6, %p781_p3 }
 0x33a   : > { %p784_p13 = pnand %p783_p12, %p777_p7 }
 0x33c   : > { %787 = shalt.err (!%p784_p13)
}
 0x33d   : > { %s836_s10 = smov 256   ;;  %s837_s25 = smov 16  }
 0x33e   : > { %660 = dma.vmem_to_hbm [thread:$0]  (%p1108_p11), %s1045_s9, 1024, %s1050_s13, %s515_s22, %s836_s10, %s836_s10, %s837_s25  }
 0x33f PF: > { %s543_s11 = sand.u32 1, %s814_s18   ;;  %p1109_p8 = scmp.ne.s32.totalorder %s1106_s6, 0 }
 0x340   : > { %p1110_p10 = scmp.ge.s32.totalorder %s826_s21, 2  ;;  %s544_s17 = scalar_lea.sflag [#allocation4], %s543_s11 }
 0x342   : > { %p667_p0 = pnand %p1110_p10, %p1109_p8 }
 0x344   : > { %809 = dma.done.wait (!%p667_p0), %s544_s17, 1024  }
 0x345   : > { %811 = vsyncadd (!%p667_p0), %s544_s17, 4294966272  ;;  %p18_p2 = scmp.ge.s32.totalorder %s893_s24, 4   ;;  %s1111_s18 = smov %s818_s19 }
 0x346   : > { %s1112_s19 = smov %s822_s20  ;;  %s1113_s20 = smov %s905_s27 }
 0x347   : > { %s1114_s21 = smov %s893_s24  ;;  %20 = sbr.rel (!%p18_p2) target bundleno = 5 (0x5), region = 85 }
 0x34e   :  { %549 = vsyncpa [#allocation3], 1 }
 0x34f   :  { %551 = vsyncpa [#allocation3 + $0x1], 1 }
 0x350   :  { %552 = vsyncpa [#allocation4], 1 }
 0x351   :  { %554 = vsyncpa [#allocation4 + $0x1], 1 }

</bundles_post_ra>
